<compile_context>
chip_gen: v5e
topology: v5e:2x2
jax: 0.10.0
libtpu: 0.0.40
codegen_flags: <defaults>
</compile_context>

<pallas_src>
import jax
import jax.numpy as jnp
from jax import lax
from jax.experimental import pallas as pl
from jax.experimental.pallas import tpu as pltpu


def _round_up(x, m):
    return (x + m - 1) // m * m


def _gemm_stats_kernel(a_ref, w_ref, y_ref, stats_ref):
    # a_ref:     (tm, K_pad)        im2col patches (pre-ReLU), zero-padded
    # w_ref:     (K_pad, Cout_pad)  flattened conv weight, zero-padded
    # y_ref:     (tm, Cout_pad)     pre-BN conv output (lane-dense)
    # stats_ref: (1, 2, Cout_pad)   per-tile [sum, sum-of-squares]
    a = jnp.maximum(a_ref[...], 0.0)  # fused ReLU; ReLU(0)=0 keeps zero padding valid
    y = jnp.dot(a, w_ref[...], preferred_element_type=jnp.float32)
    y_ref[...] = y
    s = jnp.sum(y, axis=0, keepdims=True)        # (1, Cout_pad)
    sq = jnp.sum(y * y, axis=0, keepdims=True)   # (1, Cout_pad)
    stats_ref[...] = jnp.concatenate([s, sq], axis=0)[None]


def _bn_apply_kernel(y_ref, scale_ref, shift_ref, o_ref):
    # Single fused pass: y * scale + shift with per-channel (1, Cout_pad) rows.
    o_ref[...] = y_ref[...] * scale_ref[...] + shift_ref[...]


def relu_conv_bn(x_nchw, w_oihw, gamma, beta, *, stride, padding, eps=1e-5, tm=256):
    """x_nchw: (N, C_in, H, W); w_oihw: (C_out, C_in, KH, KW) -> (N, C_out, Ho, Wo)."""
    N, Cin, H, W = x_nchw.shape
    Cout, _, KH, KW = w_oihw.shape
    Ho = (H + 2 * padding - KH) // stride + 1
    Wo = (W + 2 * padding - KW) // stride + 1

    M = N * Ho * Wo
    K = KH * KW * Cin
    M_pad = _round_up(M, tm)
    K_pad = _round_up(K, 128)
    Cout_pad = _round_up(Cout, 128)
    num_m = M_pad // tm

    # ---- layout plumbing (XLA): NCHW->NHWC, spatial zero pad, im2col --------
    x_nhwc = jnp.transpose(x_nchw, (0, 2, 3, 1)).astype(jnp.float32)
    x_p = jnp.pad(x_nhwc, ((0, 0), (padding, padding), (padding, padding), (0, 0)))
    patches = []
    for kh in range(KH):
        for kw in range(KW):
            patches.append(
                x_p[:, kh:kh + (Ho - 1) * stride + 1:stride,
                       kw:kw + (Wo - 1) * stride + 1:stride, :])
    a = jnp.concatenate(patches, axis=-1).reshape(M, K)       # (M, KH*KW*Cin)
    a = jnp.pad(a, ((0, M_pad - M), (0, K_pad - K)))          # lane/sublane dense

    w_flat = jnp.transpose(w_oihw, (2, 3, 1, 0)).reshape(K, Cout).astype(jnp.float32)
    w_flat = jnp.pad(w_flat, ((0, K_pad - K), (0, Cout_pad - Cout)))

    cparams = pltpu.CompilerParams(
        dimension_semantics=("parallel",),          # independent M tiles -> both TCs on v7x
        vmem_limit_bytes=32 * 1024 * 1024,          # explicit budget; safe on v5e/v6e/v7x
    )

    # ---- kernel 1: fused ReLU + conv-as-GEMM + partial BN stats --------------
    y_pad, part_stats = pl.pallas_call(
        _gemm_stats_kernel,
        grid=(num_m,),
        in_specs=[
            pl.BlockSpec((tm, K_pad), lambda i: (i, 0)),
            pl.BlockSpec((K_pad, Cout_pad), lambda i: (0, 0)),   # weight resident
        ],
        out_specs=[
            pl.BlockSpec((tm, Cout_pad), lambda i: (i, 0)),
            pl.BlockSpec((1, 2, Cout_pad), lambda i: (i, 0, 0)),
        ],
        out_shape=[
            jax.ShapeDtypeStruct((M_pad, Cout_pad), jnp.float32),
            jax.ShapeDtypeStruct((num_m, 2, Cout_pad), jnp.float32),
        ],
        compiler_params=cparams,
    )(a, w_flat)

    # ---- global BN stats -> per-channel scale/shift (tiny XLA math) ---------
    # Padded M rows are exactly zero (zero A rows -> zero y rows), so they
    # contribute nothing to sum/sumsq; divide by the true count M.
    stats = jnp.sum(part_stats, axis=0)                     # (2, Cout_pad)
    mean = stats[0] / M
    var = jnp.maximum(stats[1] / M - mean * mean, 0.0)      # biased (training-mode) variance
    gamma_p = jnp.pad(gamma.astype(jnp.float32), (0, Cout_pad - Cout))
    beta_p = jnp.pad(beta.astype(jnp.float32), (0, Cout_pad - Cout))
    inv_std = lax.rsqrt(var + eps)
    scale_vec = gamma_p * inv_std
    shift_vec = beta_p - mean * scale_vec
    scale = scale_vec.reshape(1, Cout_pad)
    shift = shift_vec.reshape(1, Cout_pad)

    # ---- kernel 2: lane-dense BN apply ---------------------------------------
    out_pad = pl.pallas_call(
        _bn_apply_kernel,
        grid=(num_m,),
        in_specs=[
            pl.BlockSpec((tm, Cout_pad), lambda i: (i, 0)),
            pl.BlockSpec((1, Cout_pad), lambda i: (0, 0)),
            pl.BlockSpec((1, Cout_pad), lambda i: (0, 0)),
        ],
        out_specs=pl.BlockSpec((tm, Cout_pad), lambda i: (i, 0)),
        out_shape=jax.ShapeDtypeStruct((M_pad, Cout_pad), jnp.float32),
        compiler_params=cparams,
    )(y_pad, scale, shift)

    out = out_pad[:M, :Cout].reshape(N, Ho, Wo, Cout)
    return jnp.transpose(out, (0, 3, 1, 2))                  # back to NCHW


def _reference(x_nchw, w_oihw, gamma, beta, *, stride, padding, eps=1e-5):
    x = jnp.maximum(x_nchw, 0.0)
    y = lax.conv_general_dilated(
        x, w_oihw, window_strides=(stride, stride),
        padding=[(padding, padding), (padding, padding)],
        dimension_numbers=("NCHW", "OIHW", "NCHW"))
    mean = jnp.mean(y, axis=(0, 2, 3), keepdims=True)
    var = jnp.mean((y - mean) ** 2, axis=(0, 2, 3), keepdims=True)
    y_hat = (y - mean) * lax.rsqrt(var + eps)
    return y_hat * gamma.reshape(1, -1, 1, 1) + beta.reshape(1, -1, 1, 1)


if __name__ == "__main__":
    # Small shapes consistent with the module: C_in=4, C_out=8, k=3, stride=1, pad=1
    N, C_in, H, W = 2, 4, 16, 16
    C_out, KSIZE, STRIDE, PAD = 8, 3, 1, 1

    key = jax.random.PRNGKey(0)
    kx, kw = jax.random.split(key)
    x = jax.random.normal(kx, (N, C_in, H, W), dtype=jnp.float32)
    w = 0.1 * jax.random.normal(kw, (C_out, C_in, KSIZE, KSIZE), dtype=jnp.float32)
    # BatchNorm affine params at PyTorch init: gamma=1, beta=0.
    gamma = jnp.ones((C_out,), jnp.float32)
    beta = jnp.zeros((C_out,), jnp.float32)

    out = relu_conv_bn(x, w, gamma, beta, stride=STRIDE, padding=PAD)
    out = jax.block_until_ready(out)

    ref = _reference(x, w, gamma, beta, stride=STRIDE, padding=PAD)
    assert out.shape == (N, C_out, H, W)
    assert jnp.allclose(out, ref, atol=1e-4, rtol=1e-4), float(jnp.max(jnp.abs(out - ref)))

    print("KERNEL_OK")
</pallas_src>

<mosaic_0001>
module attributes {stable_mosaic.version = 11 : i64} {
  func.func @_gemm_stats_kernel(%arg0: i32, %arg1: memref<256x128xf32, #tpu.memory_space<vmem>>, %arg2: memref<128x128xf32, #tpu.memory_space<vmem>>, %arg3: memref<256x128xf32, #tpu.memory_space<vmem>>, %arg4: memref<1x2x128xf32, #tpu.memory_space<vmem>>) attributes {dimension_semantics = [#tpu.dimension_semantics<parallel>], iteration_bounds = array<i64: 2>, scalar_prefetch = 0 : i64, scratch_operands = 0 : i64, tpu.core_type = #tpu.core_type<tc>, window_params = [{transform_indices = @transform_0, window_bounds = array<i64: 256, 128>}, {pipeline_mode = #tpu.pipeline_mode<synchronous>, transform_indices = @transform_1, window_bounds = array<i64: 128, 128>}, {transform_indices = @transform_2, window_bounds = array<i64: 256, 128>}, {transform_indices = @transform_3, window_bounds = array<i64: 1, 2, 128>}]} {
    %c0 = arith.constant 0 : index
    %c0_0 = arith.constant 0 : index
    %0 = vector.load %arg1[%c0, %c0_0] : memref<256x128xf32, #tpu.memory_space<vmem>>, vector<256x128xf32>
    %cst = arith.constant 0.000000e+00 : f32
    %1 = vector.broadcast %cst : f32 to vector<256x128xf32>
    %2 = arith.maximumf %0, %1 : vector<256x128xf32>
    %c0_1 = arith.constant 0 : index
    %c0_2 = arith.constant 0 : index
    %3 = vector.load %arg2[%c0_1, %c0_2] : memref<128x128xf32, #tpu.memory_space<vmem>>, vector<128x128xf32>
    %cst_3 = arith.constant dense<0.000000e+00> : vector<256x128xf32>
    %4 = tpu.matmul %2, %3, %cst_3 {dimension_numbers = #tpu.dot_dimension_numbers<[1], [0], [0], [1], [0, 0, 1, 1], [], []>} : vector<256x128xf32>, vector<128x128xf32>, vector<256x128xf32> -> vector<256x128xf32>
    %c0_4 = arith.constant 0 : index
    %c0_5 = arith.constant 0 : index
    %5 = vector.load %arg3[%c0_4, %c0_5] : memref<256x128xf32, #tpu.memory_space<vmem>>, vector<256x128xf32>
    tpu.vector_store %arg3[%c0_4, %c0_5], %4 {strides = array<i32>} : memref<256x128xf32, #tpu.memory_space<vmem>>, vector<256x128xf32>,
    %cst_6 = arith.constant dense<0.000000e+00> : vector<128xf32>
    %6 = vector.multi_reduction <add>, %4, %cst_6 [0] : vector<256x128xf32> to vector<128xf32>
    %7 = vector.shape_cast %6 : vector<128xf32> to vector<1x128xf32>
    %8 = arith.mulf %4, %4 : vector<256x128xf32>
    %cst_7 = arith.constant dense<0.000000e+00> : vector<128xf32>
    %9 = vector.multi_reduction <add>, %8, %cst_7 [0] : vector<256x128xf32> to vector<128xf32>
    %10 = vector.shape_cast %9 : vector<128xf32> to vector<1x128xf32>
    %11 = tpu.concatenate %7, %10 in 0 : vector<1x128xf32>, vector<1x128xf32> -> vector<2x128xf32>
    %12 = vector.shape_cast %11 : vector<2x128xf32> to vector<1x2x128xf32>
    %c0_8 = arith.constant 0 : index
    %c0_9 = arith.constant 0 : index
    %c0_10 = arith.constant 0 : index
    %13 = vector.load %arg4[%c0_8, %c0_9, %c0_10] : memref<1x2x128xf32, #tpu.memory_space<vmem>>, vector<1x2x128xf32>
    tpu.vector_store %arg4[%c0_8, %c0_9, %c0_10], %12 {strides = array<i32>} : memref<1x2x128xf32, #tpu.memory_space<vmem>>, vector<1x2x128xf32>,
    return
  }
  func.func @transform_0(%arg0: i32) -> (i32, i32) {
    %c0_i32 = arith.constant 0 : i32
    %c0_i32_0 = arith.constant 0 : i32
    return %arg0, %c0_i32 : i32, i32
  }
  func.func @transform_1(%arg0: i32) -> (i32, i32) {
    %c0_i32 = arith.constant 0 : i32
    %c0_i32_0 = arith.constant 0 : i32
    %c0_i32_1 = arith.constant 0 : i32
    return %c0_i32, %c0_i32_0 : i32, i32
  }
  func.func @transform_2(%arg0: i32) -> (i32, i32) {
    %c0_i32 = arith.constant 0 : i32
    %c0_i32_0 = arith.constant 0 : i32
    return %arg0, %c0_i32 : i32, i32
  }
  func.func @transform_3(%arg0: i32) -> (i32, i32, i32) {
    %c0_i32 = arith.constant 0 : i32
    %c0_i32_0 = arith.constant 0 : i32
    %c0_i32_1 = arith.constant 0 : i32
    return %arg0, %c0_i32, %c0_i32_0 : i32, i32, i32
  }
}

</mosaic_0001>

<bundles_post_ra>
// kernel: tpu_custom_call.1
= control target key start
LH: loop header
LB: loop body
LE: loop exit
PB: predicated region body
PF: predicated region fallthrough
CT: control target
= control target key end

     0   :  { %9 = vsyncpa [#allocation3], 0  ;;  %s1389_s0 = inlined_call_operand.hbm [shape: f32[512,128], index: 0, kind: input, shape index: {}]   ;;  %s1390_s1 = inlined_call_operand.hbm [shape: f32[128,128], index: 1, kind: input, shape index: {}]   ;;  %s1391_s2 = inlined_call_operand.hbm [shape: f32[512,128], index: 2, kind: output, shape index: {0}]   ;;  %s1392_s3 = inlined_call_operand.hbm [shape: f32[2,2,128], index: 3, kind: output, shape index: {1}]  }
   0x1   :  { %11 = vsyncpa [#allocation3 + $0x1], 0 }
   0x2   :  { %12 = vsyncpa [#allocation6], 0 }
   0x3   :  { %13 = vsyncpa [#allocation4], 0 }
   0x4   :  { %15 = vsyncpa [#allocation4 + $0x1], 0 }
   0x5   :  { %16 = vsyncpa [#allocation9], 0 }
   0x6   :  { %18 = vsyncpa [#allocation9 + $0x1], 0  ;;  %s1030_s12 = smov 0   ;;  %s1032_s13 = smov 0  }
   0x7   :  { %s1034_s14 = smov 0   ;;  %s1036_s15 = smov 0  }
   0x8 LB: > { %s1051_s16 = sadd.s32 4294967295, %s1003_s15   ;;  %s706_s17 = sadd.s32 4294967294, %s1003_s15   ;;  %s1003_s15 = sphi %s1036_s15, %s1402_s15   ;;  %s999_s14 = sphi %s1034_s14, %s1401_s14   ;;  %s995_s13 = sphi %s1032_s13, %s1400_s13   ;;  %s991_s12 = sphi %s1030_s12, %s1399_s12  }
   0x9   : > { %p44_p0 = scmp.ne.s32.totalorder %s995_s13, %s991_s12  ;;  %p45_p1 = scmp.eq.s32.totalorder %s1051_s16, 0 }
   0xa   : > { %p89_p2 = scmp.eq.s32.totalorder %s1051_s16, 1  ;;  %p95_p3 = scmp.eq.s32.totalorder %s706_s17, 1 }
   0xb   : > { %p1060_p4 = por %p45_p1, %p44_p0  ;;  %p707_p5 = scmp.ge.s32.totalorder %s1003_s15, 1 }
   0xc   : > { %p1065_p6 = por %p95_p3, %p44_p0  ;;  %p128_p7 = scmp.lt.s32.totalorder %s1003_s15, 3 }
   0xd   : > { %s139_s22 = sshll.u32 %s1390_s1, 4  ;;  %s1005_s24 = smov [#allocation5]   ;;  %s140_s22 = int_to_ptr.hbm [resolvable:$true] %s139_s22 }
   0xe   : > { %p1073_p8 = pnand %p707_p5, %p128_p7  ;;  %s141_s25 = sshll.u32 %s1005_s24, 4  ;;  %s142_s25 = int_to_ptr.vmem [resolvable:$true] %s141_s25 }
   0xf   : > { %s1083_s26 = sadd.s32 1, %s1003_s15   ;;  %s1006_s27 = smov 128  }
  0x10   : > { %p785_p9 = pneg %p1073_p8  ;;  %s1007_s28 = smov 8  }
  0x11   : > { %s28_s29 = ssub.s32 %s1003_s15, %s1083_s26  ;;  %s31_s30 = sadd.s32 1, %s999_s14 }
  0x12   : > { %p786_p10 = pnand %p785_p9, %p45_p1  ;;  %p29_p12 = scmp.eq.s32.totalorder %s28_s29, 0 }
  0x13   : > { %p38_p13 = scmp.ne.s32.totalorder %s999_s14, %s995_s13  ;;  %p39_p0 = scmp.eq.s32.totalorder %s1003_s15, 0 }
  0x14   : > { %788 = dma.hbm_to_vmem [thread:$0]  (!%p786_p10), %s140_s22, 2048, %s142_s25, [#allocation6], %s1006_s27, %s1006_s27, %s1007_s28  }
  0x15   : > { %s1095_s4 = scalar_select %p29_p12, %s999_s14, %s31_s30  }
  0x16   : > { %p1099_p3 = por %p89_p2, %p38_p13  ;;  %p801_p5 = scmp.lt.s32.totalorder %s1003_s15, 2 }
  0x17   : > { %s155_s6 = sand.u32 1, %s999_s14   ;;  %s725_s7 = sshll.u32 %s1003_s15, 8 }
  0x18   : > { %p40_p7 = por %p39_p0, %p38_p13  ;;  %s710_s8 = sshll.u32 %s155_s6, 8 }
  0x19   : > { %s164_s11 = scalar_lea.hbm %s1389_s0, %s725_s7  ;;  %s159_s20 = scalar_lea.vmem [#allocation2], %s710_s8 }
  0x1a   : > { %s165_s17 = sshll.u32 %s164_s11, 4  ;;  %s167_s21 = sshll.u32 %s159_s20, 4  ;;  %s166_s17 = int_to_ptr.hbm [resolvable:$true] %s165_s17  ;;  %s168_s21 = int_to_ptr.vmem [resolvable:$true] %s167_s21 }
  0x1b   : > { %p1109_p9 = pnand %p801_p5, %p40_p7  ;;  %s156_s24 = scalar_lea.sflag [#allocation3], %s155_s6 }
  0x1c   : > { %s871_s25 = sshra.s32 %s166_s17, 4  ;;  %s878_s8 = scalar_lea.hbm %s1389_s0, 512  ;;  %s872_s25 = int_to_ptr.hbm [resolvable:$true] %s871_s25 }
  0x1d   : > { %s873_s29 = scalar_lea.hbm %s872_s25, 256  ;;  %p875_p10 = pneg %p1109_p9 }
  0x1e   : > { %p874_p2 = scmp.ne.s32.totalorder %s872_s25, %s873_s29  ;;  %p879_p0 = scmp.lt.s32.totalorder %s872_s25, %s1389_s0 }
  0x1f   : > { %p880_p5 = scmp.lt.s32.totalorder %s878_s8, %s873_s29 }
  0x20   : > { %p876_p12 = pnand %p875_p10, %p874_p2 }
  0x21   : > { %p881_p7 = por %p880_p5, %p879_p0 }
  0x22   : > { %p877_p13 = pneg %p876_p12 }
  0x24   : > { %p882_p11 = pnand %p881_p7, %p877_p13 }
  0x26   : > { %885 = shalt.err (!%p882_p11)
}
  0x27   : > { %792 = dma.hbm_to_vmem [thread:$0]  (!%p1109_p9), %s166_s17, 4096, %s168_s21, %s156_s24, %s1006_s27, %s1006_s27, %s1007_s28  }
  0x28   : > { %179 = sbr.rel (%p1073_p8) target bundleno = 330 (0x14a), region = 28  ;;  %s1129_s6 = sand.u32 (!%p1073_p8), 1, %s995_s13  }
  0x29   : > { %s714_s11 = sshll.u32 (!%p1073_p8), %s1129_s6, 8  ;;  %s182_s20 = scalar_lea.sflag (!%p1073_p8), [#allocation3], %s1129_s6 }
  0x2a   : > { %s1135_s25 = scalar_lea.vmem (!%p1073_p8), [#allocation2], %s714_s11 }
  0x2d   : > { %974 = dma.done.wait (%p1060_p4), %s182_s20, 4096  }
  0x2e   : > { %976 = vsyncadd (%p1060_p4), %s182_s20, 4294963200 }
  0x2f   : > { %978 = dma.done.wait (%p45_p1), [#allocation6], 2048  }
  0x30   : > { %980 = vsyncadd (%p45_p1), [#allocation6], 4294965248  ;;  %v300_v0 = vld [vmem:[#allocation5 + $0x78] sm:$0xff]  ;;  %v299_v1 = vld [vmem:[#allocation5 + $0x70] sm:$0xff]  ;;  %s1181_s18 = scalar_lea.vmem [#allocation7], %s714_s11  ;;  %s726_s23 = sshll.u32 %s1051_s16, 8 }
  0x31   : > { %301 = vmatpush.msra.mxu0 %v300_v0  ;;  %727 = vmatpush.msra.mxu1 %v300_v0  ;;  %v298_v2 = vld [vmem:[#allocation5 + $0x68] sm:$0xff]  ;;  %v297_v3 = vld [vmem:[#allocation5 + $0x60] sm:$0xff]  ;;  %v296_v4 = vld [vmem:[#allocation5 + $0x58] sm:$0xff]  ;;  %s572_s17 = scalar_lea.hbm %s1391_s2, %s726_s23  ;;  %s573_s21 = sshll.u32 %s1181_s18, 4  ;;  %s574_s21 = int_to_ptr.vmem [resolvable:$true] %s573_s21 }
  0x32   : > { %728 = vmatpush.msra.mxu2 %v300_v0  ;;  %729 = vmatpush.msra.mxu3 %v300_v0  ;;  %v295_v5 = vld [vmem:[#allocation5 + $0x50] sm:$0xff]  ;;  %v294_v6 = vld [vmem:[#allocation5 + $0x48] sm:$0xff]  ;;  %v293_v7 = vld [vmem:[#allocation5 + $0x40] sm:$0xff]  ;;  %s575_s22 = sshll.u32 %s572_s17, 4  ;;  %s556_s24 = scalar_lea.sflag [#allocation4], %s1129_s6  ;;  %s576_s22 = int_to_ptr.hbm [resolvable:$true] %s575_s22 }
  0x33   : > { %302 = vmatpush.msra.mxu0 %v299_v1  ;;  %730 = vmatpush.msra.mxu1 %v299_v1  ;;  %v292_v8 = vld [vmem:[#allocation5 + $0x38] sm:$0xff]  ;;  %v291_v9 = vld [vmem:[#allocation5 + $0x30] sm:$0xff]  ;;  %v290_v10 = vld [vmem:[#allocation5 + $0x28] sm:$0xff]  ;;  %s915_s29 = sshra.s32 %s576_s22, 4  ;;  %s921_s9 = scalar_lea.hbm %s1391_s2, 512  ;;  %s916_s29 = int_to_ptr.hbm [resolvable:$true] %s915_s29 }
  0x34   : > { %731 = vmatpush.msra.mxu2 %v299_v1  ;;  %732 = vmatpush.msra.mxu3 %v299_v1  ;;  %v289_v11 = vld [vmem:[#allocation5 + $0x20] sm:$0xff]  ;;  %v288_v12 = vld [vmem:[#allocation5 + $0x18] sm:$0xff]  ;;  %v287_v13 = vld [vmem:[#allocation5 + $0x10] sm:$0xff]  ;;  %s917_s30 = scalar_lea.hbm %s916_s29, 256  ;;  %p922_p11 = scmp.lt.s32.totalorder %s916_s29, %s1391_s2 }
  0x35   : > { %303 = vmatpush.msra.mxu0 %v298_v2  ;;  %733 = vmatpush.msra.mxu1 %v298_v2  ;;  %v221_v14 = vld [vmem:[%s1135_s25] sm:$0xff]  ;;  %v286_v16 = vld [vmem:[#allocation5 + $0x8] sm:$0xff]  ;;  %v223_v30 = vld [vmem:[%s1135_s25 + $0x10] sm:$0xff]  ;;  %p918_p1 = scmp.ne.s32.totalorder %s916_s29, %s917_s30  ;;  %p923_p9 = scmp.lt.s32.totalorder %s921_s9, %s917_s30 }
  0x36   : > { %734 = vmatpush.msra.mxu2 %v298_v2  ;;  %735 = vmatpush.msra.mxu3 %v298_v2  ;;  %v229_v15 = vld [vmem:[%s1135_s25 + $0x40] sm:$0xff]  ;;  %v253_v19 = vmax.f32 %v221_v14, 0.0  ;;  %v222_v22 = vld [vmem:[%s1135_s25 + $0x8] sm:$0xff]  ;;  %v231_v31 = vld [vmem:[%s1135_s25 + $0x50] sm:$0xff]  ;;  %v255_v33 = vmax.f32 %v223_v30, 0.0 }
  0x37   : > { %304 = vmatpush.msra.mxu0 %v297_v3  ;;  %736 = vmatpush.msra.mxu1 %v297_v3  ;;  %v237_v17 = vld [vmem:[%s1135_s25 + $0x80] sm:$0xff]  ;;  %v261_v20 = vmax.f32 %v229_v15, 0.0  ;;  %v230_v23 = vld [vmem:[%s1135_s25 + $0x48] sm:$0xff]  ;;  %v254_v25 = vmax.f32 %v222_v22, 0.0  ;;  %v239_v32 = vld [vmem:[%s1135_s25 + $0x90] sm:$0xff]  ;;  %v263_v34 = vmax.f32 %v231_v31, 0.0  ;;  %p919_p4 = pnand %p918_p1, %p1099_p3  ;;  %p924_p2 = por %p923_p9, %p922_p11 }
  0x38   : > { %737 = vmatpush.msra.mxu2 %v297_v3  ;;  %738 = vmatpush.msra.mxu3 %v297_v3  ;;  %v285_v18 = vld [vmem:[#allocation5] sm:$0xff]  ;;  %v269_v21 = vmax.f32 %v237_v17, 0.0  ;;  %v238_v24 = vld [vmem:[%s1135_s25 + $0x88] sm:$0xff]  ;;  %v262_v26 = vmax.f32 %v230_v23, 0.0  ;;  %v271_v35 = vmax.f32 %v239_v32, 0.0  ;;  %v224_v38 = vld [vmem:[%s1135_s25 + $0x18] sm:$0xff] }
  0x39   : > { %305 = vmatpush.msra.mxu0 %v296_v4  ;;  %739 = vmatpush.msra.mxu1 %v296_v4  ;;  %v270_v27 = vmax.f32 %v238_v24, 0.0  ;;  %v245_v28 = vld [vmem:[%s1135_s25 + $0xc0] sm:$0xff]  ;;  %v246_v36 = vld [vmem:[%s1135_s25 + $0xc8] sm:$0xff]  ;;  %v232_v39 = vld [vmem:[%s1135_s25 + $0x58] sm:$0xff]  ;;  %v256_v41 = vmax.f32 %v224_v38, 0.0  ;;  %p920_p8 = pneg %p919_p4 }
  0x3a   : > { %740 = vmatpush.msra.mxu2 %v296_v4  ;;  %741 = vmatpush.msra.mxu3 %v296_v4  ;;  %v277_v29 = vmax.f32 %v245_v28, 0.0  ;;  %v278_v37 = vmax.f32 %v246_v36, 0.0  ;;  %v240_v40 = vld [vmem:[%s1135_s25 + $0x98] sm:$0xff]  ;;  %v264_v42 = vmax.f32 %v232_v39, 0.0  ;;  %v247_v44 = vld [vmem:[%s1135_s25 + $0xd0] sm:$0xff]  ;;  %v225_v46 = vld [vmem:[%s1135_s25 + $0x20] sm:$0xff] }
  0x3b   : > { %306 = vmatpush.msra.mxu0 %v295_v5  ;;  %742 = vmatpush.msra.mxu1 %v295_v5  ;;  %v272_v43 = vmax.f32 %v240_v40, 0.0  ;;  %v279_v45 = vmax.f32 %v247_v44, 0.0  ;;  %v233_v47 = vld [vmem:[%s1135_s25 + $0x60] sm:$0xff]  ;;  %v248_v49 = vld [vmem:[%s1135_s25 + $0xd8] sm:$0xff]  ;;  %v257_v50 = vmax.f32 %v225_v46, 0.0  ;;  %v226_v54 = vld [vmem:[%s1135_s25 + $0x28] sm:$0xff]  ;;  %p925_p10 = pnand %p924_p2, %p920_p8 }
  0x3c   : > { %743 = vmatpush.msra.mxu2 %v295_v5  ;;  %744 = vmatpush.msra.mxu3 %v295_v5  ;;  %v241_v48 = vld [vmem:[%s1135_s25 + $0xa0] sm:$0xff]  ;;  %v265_v51 = vmax.f32 %v233_v47, 0.0  ;;  %v280_v53 = vmax.f32 %v248_v49, 0.0  ;;  %v234_v55 = vld [vmem:[%s1135_s25 + $0x68] sm:$0xff]  ;;  %v258_v58 = vmax.f32 %v226_v54, 0.0  ;;  %v227_v62 = vld [vmem:[%s1135_s25 + $0x30] sm:$0xff] }
  0x3d   : > { %307 = vmatpush.msra.mxu0 %v294_v6  ;;  %745 = vmatpush.msra.mxu1 %v294_v6  ;;  %v273_v52 = vmax.f32 %v241_v48, 0.0  ;;  %v242_v56 = vld [vmem:[%s1135_s25 + $0xa8] sm:$0xff]  ;;  %v249_v57 = vld [vmem:[%s1135_s25 + $0xe0] sm:$0xff]  ;;  %v266_v59 = vmax.f32 %v234_v55, 0.0  ;;  %v235_v63 = vld [vmem:[%s1135_s25 + $0x70] sm:$0xff]  ;;  %v259_v2 = vmax.f32 %v227_v62, 0.0 }
  0x3e   : > { %746 = vmatpush.msra.mxu2 %v294_v6  ;;  %747 = vmatpush.msra.mxu3 %v294_v6  ;;  %v274_v60 = vmax.f32 %v242_v56, 0.0  ;;  %v281_v61 = vmax.f32 %v249_v57, 0.0  ;;  %v243_v0 = vld [vmem:[%s1135_s25 + $0xb0] sm:$0xff]  ;;  %v250_v1 = vld [vmem:[%s1135_s25 + $0xe8] sm:$0xff]  ;;  %v267_v3 = vmax.f32 %v235_v63, 0.0  ;;  %v228_v6 = vld [vmem:[%s1135_s25 + $0x38] sm:$0xff] }
  0x3f   : > { %308 = vmatpush.msra.mxu0 %v293_v7  ;;  %748 = vmatpush.msra.mxu1 %v293_v7  ;;  %v275_v4 = vmax.f32 %v243_v0, 0.0  ;;  %v282_v5 = vmax.f32 %v250_v1, 0.0  ;;  %v252_v14 = vld [vmem:[%s1135_s25 + $0xf8] sm:$0xff] }
  0x40   : > { %749 = vmatpush.msra.mxu2 %v293_v7  ;;  %750 = vmatpush.msra.mxu3 %v293_v7  ;;  %v236_v7 = vld [vmem:[%s1135_s25 + $0x78] sm:$0xff]  ;;  %v284_v15 = vmax.f32 %v252_v14, 0.0 }
  0x41   : > { %309 = vmatpush.msra.mxu0 %v292_v8  ;;  %751 = vmatpush.msra.mxu1 %v292_v8 }
  0x42   : > { %752 = vmatpush.msra.mxu2 %v292_v8  ;;  %753 = vmatpush.msra.mxu3 %v292_v8  ;;  %v244_v8 = vld [vmem:[%s1135_s25 + $0xb8] sm:$0xff] }
  0x43   : > { %310 = vmatpush.msra.mxu0 %v291_v9  ;;  %754 = vmatpush.msra.mxu1 %v291_v9 }
  0x44   : > { %755 = vmatpush.msra.mxu2 %v291_v9  ;;  %756 = vmatpush.msra.mxu3 %v291_v9  ;;  %v251_v9 = vld [vmem:[%s1135_s25 + $0xf0] sm:$0xff] }
  0x45   : > { %311 = vmatpush.msra.mxu0 %v290_v10  ;;  %757 = vmatpush.msra.mxu1 %v290_v10 }
  0x46   : > { %758 = vmatpush.msra.mxu2 %v290_v10  ;;  %759 = vmatpush.msra.mxu3 %v290_v10  ;;  %v260_v10 = vmax.f32 %v228_v6, 0.0 }
  0x47   : > { %312 = vmatpush.msra.mxu0 %v289_v11  ;;  %760 = vmatpush.msra.mxu1 %v289_v11 }
  0x48   : > { %761 = vmatpush.msra.mxu2 %v289_v11  ;;  %762 = vmatpush.msra.mxu3 %v289_v11  ;;  %v268_v11 = vmax.f32 %v236_v7, 0.0 }
  0x49   : > { %313 = vmatpush.msra.mxu0 %v288_v12  ;;  %763 = vmatpush.msra.mxu1 %v288_v12 }
  0x4a   : > { %764 = vmatpush.msra.mxu2 %v288_v12  ;;  %765 = vmatpush.msra.mxu3 %v288_v12  ;;  %v276_v12 = vmax.f32 %v244_v8, 0.0 }
  0x4b   : > { %314 = vmatpush.msra.mxu0 %v287_v13  ;;  %766 = vmatpush.msra.mxu1 %v287_v13 }
  0x4c   : > { %767 = vmatpush.msra.mxu2 %v287_v13  ;;  %768 = vmatpush.msra.mxu3 %v287_v13  ;;  %v283_v13 = vmax.f32 %v251_v9, 0.0 }
  0x4d   : > { %315 = vmatpush.msra.mxu0 %v286_v16  ;;  %769 = vmatpush.msra.mxu1 %v286_v16 }
  0x4e   : > { %770 = vmatpush.msra.mxu2 %v286_v16  ;;  %771 = vmatpush.msra.mxu3 %v286_v16 }
  0x4f   : > { %316 = vmatpush.msra.mxu0 %v285_v18  ;;  %772 = vmatpush.msra.mxu1 %v285_v18 }
  0x50   : > { %317 = vmatmul.f32.vlgmr.msra.gmra.mxu0 %v253_v19  ;;  %341 = vmatmul.f32.vlgmr.msra.gmra.mxu1 %v261_v20 }
  0x51   : > { %773 = vmatpush.msra.mxu2 %v285_v18  ;;  %774 = vmatpush.msra.mxu3 %v285_v18 }
  0x52   : > { %365 = vmatmul.f32.vlgmr.msra.gmra.mxu2 %v269_v21  ;;  %389 = vmatmul.f32.vlgmr.msra.gmra.mxu3 %v277_v29 }
  0x58   : > { %320 = vmatmul.f32.gmra.mxu0 %v254_v25  ;;  %344 = vmatmul.f32.gmra.mxu1 %v262_v26 }
  0x5a   : > { %368 = vmatmul.f32.gmra.mxu2 %v270_v27  ;;  %392 = vmatmul.f32.gmra.mxu3 %v278_v37 }
  0x60   : > { %323 = vmatmul.f32.gmra.mxu0 %v255_v33  ;;  %347 = vmatmul.f32.gmra.mxu1 %v263_v34 }
  0x62   : > { %371 = vmatmul.f32.gmra.mxu2 %v271_v35  ;;  %395 = vmatmul.f32.gmra.mxu3 %v279_v45 }
  0x68   : > { %326 = vmatmul.f32.gmra.mxu0 %v256_v41  ;;  %350 = vmatmul.f32.gmra.mxu1 %v264_v42 }
  0x6a   : > { %374 = vmatmul.f32.gmra.mxu2 %v272_v43  ;;  %398 = vmatmul.f32.gmra.mxu3 %v280_v53 }
  0x70   : > { %329 = vmatmul.f32.gmra.mxu0 %v257_v50  ;;  %353 = vmatmul.f32.gmra.mxu1 %v265_v51 }
  0x72   : > { %377 = vmatmul.f32.gmra.mxu2 %v273_v52  ;;  %401 = vmatmul.f32.gmra.mxu3 %v281_v61 }
  0x78   : > { %332 = vmatmul.f32.gmra.mxu0 %v258_v58  ;;  %356 = vmatmul.f32.gmra.mxu1 %v266_v59 }
  0x7a   : > { %380 = vmatmul.f32.gmra.mxu2 %v274_v60  ;;  %404 = vmatmul.f32.gmra.mxu3 %v282_v5 }
  0x80   : > { %335 = vmatmul.f32.gmra.mxu0 %v259_v2  ;;  %359 = vmatmul.f32.gmra.mxu1 %v267_v3 }
  0x82   : > { %383 = vmatmul.f32.gmra.mxu2 %v275_v4  ;;  %407 = vmatmul.f32.gmra.mxu3 %v283_v13 }
  0x88   : > { %338 = vmatmul.f32.gmra.mxu0 %v260_v10  ;;  %362 = vmatmul.f32.gmra.mxu1 %v268_v11 }
  0x8a   : > { %386 = vmatmul.f32.gmra.mxu2 %v276_v12  ;;  %410 = vmatmul.f32.gmra.mxu3 %v284_v15 }
  0xcd   : > { %v318_v16 = vpop.f32.mrf.mxu0  ;;  %v1177_v17 = vpop.f32.mrf.mxu1 }
  0xce   : > { %414 = vst [vmem:[%s1181_s18] sm:$0xff] %v318_v16  ;;  %v483_v38 = vmul.f32 %v318_v16, %v318_v16  ;;  %v491_v2 = vmul.f32 %v1177_v17, %v1177_v17 }
  0xcf   : > { %422 = vst [vmem:[%s1181_s18 + $0x40] sm:$0xff] %v1177_v17 }
  0xd5   : > { %v321_v18 = vpop.f32.mrf.mxu0  ;;  %v1186_v19 = vpop.f32.mrf.mxu1 }
  0xd6   : > { %415 = vst [vmem:[%s1181_s18 + $0x8] sm:$0xff] %v321_v18  ;;  %v1189_v20 = vpop.f32.mrf.mxu2  ;;  %v1200_v24 = vpop.f32.mrf.mxu3  ;;  %v484_v37 = vmul.f32 %v321_v18, %v321_v18  ;;  %v446_v39 = vadd.f32 %v321_v18, %v318_v16  ;;  %v492_v5 = vmul.f32 %v1186_v19, %v1186_v19 }
  0xd7   : > { %423 = vst [vmem:[%s1181_s18 + $0x48] sm:$0xff] %v1186_v19 }
  0xd8   : > { %430 = vst [vmem:[%s1181_s18 + $0x80] sm:$0xff] %v1189_v20  ;;  %v515_v41 = vadd.f32 %v484_v37, %v483_v38 }
  0xd9   : > { %438 = vst [vmem:[%s1181_s18 + $0xc0] sm:$0xff] %v1200_v24 }
  0xdd   : > { %v324_v21 = vpop.f32.mrf.mxu0  ;;  %v1195_v22 = vpop.f32.mrf.mxu1 }
  0xde   : > { %416 = vst [vmem:[%s1181_s18 + $0x10] sm:$0xff] %v324_v21  ;;  %v1198_v23 = vpop.f32.mrf.mxu2  ;;  %v1213_v28 = vpop.f32.mrf.mxu3  ;;  %v485_v40 = vmul.f32 %v324_v21, %v324_v21  ;;  %v447_v42 = vadd.f32 %v446_v39, %v324_v21  ;;  %v493_v8 = vmul.f32 %v1195_v22, %v1195_v22  ;;  %v499_v39 = vmul.f32 %v1189_v20, %v1189_v20 }
  0xdf   : > { %424 = vst [vmem:[%s1181_s18 + $0x50] sm:$0xff] %v1195_v22 }
  0xe0   : > { %431 = vst [vmem:[%s1181_s18 + $0x88] sm:$0xff] %v1198_v23  ;;  %v516_v46 = vadd.f32 %v515_v41, %v485_v40 }
  0xe1   : > { %439 = vst [vmem:[%s1181_s18 + $0xc8] sm:$0xff] %v1213_v28 }
  0xe5   : > { %v327_v25 = vpop.f32.mrf.mxu0  ;;  %v1208_v26 = vpop.f32.mrf.mxu1 }
  0xe6   : > { %417 = vst [vmem:[%s1181_s18 + $0x18] sm:$0xff] %v327_v25  ;;  %v1211_v27 = vpop.f32.mrf.mxu2  ;;  %v1226_v32 = vpop.f32.mrf.mxu3  ;;  %v486_v43 = vmul.f32 %v327_v25, %v327_v25  ;;  %v448_v47 = vadd.f32 %v447_v42, %v327_v25  ;;  %v494_v11 = vmul.f32 %v1208_v26, %v1208_v26 }
  0xe7   : > { %425 = vst [vmem:[%s1181_s18 + $0x58] sm:$0xff] %v1208_v26 }
  0xe8   : > { %432 = vst [vmem:[%s1181_s18 + $0x90] sm:$0xff] %v1211_v27  ;;  %v517_v51 = vadd.f32 %v516_v46, %v486_v43 }
  0xe9   : > { %440 = vst [vmem:[%s1181_s18 + $0xd0] sm:$0xff] %v1226_v32 }
  0xed   : > { %v330_v29 = vpop.f32.mrf.mxu0  ;;  %v1221_v30 = vpop.f32.mrf.mxu1 }
  0xee   : > { %418 = vst [vmem:[%s1181_s18 + $0x20] sm:$0xff] %v330_v29  ;;  %v1224_v31 = vpop.f32.mrf.mxu2  ;;  %v1239_v36 = vpop.f32.mrf.mxu3  ;;  %v487_v48 = vmul.f32 %v330_v29, %v330_v29  ;;  %v449_v52 = vadd.f32 %v448_v47, %v330_v29  ;;  %v495_v16 = vmul.f32 %v1221_v30, %v1221_v30 }
  0xef   : > { %426 = vst [vmem:[%s1181_s18 + $0x60] sm:$0xff] %v1221_v30 }
  0xf0   : > { %433 = vst [vmem:[%s1181_s18 + $0x98] sm:$0xff] %v1224_v31  ;;  %v518_v54 = vadd.f32 %v517_v51, %v487_v48 }
  0xf1   : > { %441 = vst [vmem:[%s1181_s18 + $0xd8] sm:$0xff] %v1239_v36 }
  0xf5   : > { %v333_v33 = vpop.f32.mrf.mxu0  ;;  %v1234_v34 = vpop.f32.mrf.mxu1 }
  0xf6   : > { %419 = vst [vmem:[%s1181_s18 + $0x28] sm:$0xff] %v333_v33  ;;  %v1237_v35 = vpop.f32.mrf.mxu2  ;;  %v1250_v50 = vpop.f32.mrf.mxu3  ;;  %v488_v53 = vmul.f32 %v333_v33, %v333_v33  ;;  %v450_v55 = vadd.f32 %v449_v52, %v333_v33  ;;  %v496_v21 = vmul.f32 %v1234_v34, %v1234_v34 }
  0xf7   : > { %427 = vst [vmem:[%s1181_s18 + $0x68] sm:$0xff] %v1234_v34 }
  0xf8   : > { %434 = vst [vmem:[%s1181_s18 + $0xa0] sm:$0xff] %v1237_v35  ;;  %v519_v57 = vadd.f32 %v518_v54, %v488_v53 }
  0xf9   : > { %442 = vst [vmem:[%s1181_s18 + $0xe0] sm:$0xff] %v1250_v50 }
  0xfd   : > { %v336_v44 = vpop.f32.mrf.mxu0  ;;  %v360_v45 = vpop.f32.mrf.mxu1 }
  0xfe   : > { %420 = vst [vmem:[%s1181_s18 + $0x30] sm:$0xff] %v336_v44  ;;  %v1248_v49 = vpop.f32.mrf.mxu2  ;;  %v489_v56 = vmul.f32 %v336_v44, %v336_v44  ;;  %v451_v58 = vadd.f32 %v450_v55, %v336_v44  ;;  %v1260_v1 = vpop.f32.mrf.mxu3  ;;  %v497_v29 = vmul.f32 %v360_v45, %v360_v45 }
  0xff   : > { %428 = vst [vmem:[%s1181_s18 + $0x70] sm:$0xff] %v360_v45 }
 0x100   : > { %435 = vst [vmem:[%s1181_s18 + $0xa8] sm:$0xff] %v1248_v49  ;;  %v520_v61 = vadd.f32 %v519_v57, %v489_v56 }
 0x101   : > { %443 = vst [vmem:[%s1181_s18 + $0xe8] sm:$0xff] %v1260_v1 }
 0x105   : > { %v339_v59 = vpop.f32.mrf.mxu0  ;;  %v363_v60 = vpop.f32.mrf.mxu1 }
 0x106   : > { %421 = vst [vmem:[%s1181_s18 + $0x38] sm:$0xff] %v339_v59  ;;  %v452_v62 = vadd.f32 %v451_v58, %v339_v59  ;;  %v490_v63 = vmul.f32 %v339_v59, %v339_v59  ;;  %v1258_v0 = vpop.f32.mrf.mxu2  ;;  %v1280_v15 = vpop.f32.mrf.mxu3  ;;  %v498_v33 = vmul.f32 %v363_v60, %v363_v60 }
 0x107   : > { %429 = vst [vmem:[%s1181_s18 + $0x78] sm:$0xff] %v363_v60 }
 0x108   : > { %v453_v3 = vadd.f32 %v452_v62, %v1177_v17  ;;  %v521_v4 = vadd.f32 %v520_v61, %v490_v63  ;;  %436 = vst [vmem:[%s1181_s18 + $0xb0] sm:$0xff] %v1258_v0 }
 0x109   : > { %444 = vst [vmem:[%s1181_s18 + $0xf0] sm:$0xff] %v1280_v15 }
 0x10a   : > { %v454_v6 = vadd.f32 %v453_v3, %v1186_v19  ;;  %v522_v7 = vadd.f32 %v521_v4, %v491_v2 }
 0x10c   : > { %v455_v9 = vadd.f32 %v454_v6, %v1195_v22  ;;  %v523_v10 = vadd.f32 %v522_v7, %v492_v5 }
 0x10e   : > { %v524_v12 = vadd.f32 %v523_v10, %v493_v8  ;;  %v456_v13 = vadd.f32 %v455_v9, %v1208_v26  ;;  %v387_v14 = vpop.f32.mrf.mxu2  ;;  %v1295_v38 = vpop.f32.mrf.mxu3 }
 0x10f   : > { %437 = vst [vmem:[%s1181_s18 + $0xb8] sm:$0xff] %v387_v14 }
 0x110   : > { %v457_v17 = vadd.f32 %v456_v13, %v1221_v30  ;;  %v525_v18 = vadd.f32 %v524_v12, %v494_v11  ;;  %445 = vst [vmem:[%s1181_s18 + $0xf8] sm:$0xff] %v1295_v38 }
 0x112   : > { %v458_v19 = vadd.f32 %v457_v17, %v1234_v34  ;;  %v526_v22 = vadd.f32 %v525_v18, %v495_v16 }
 0x114   : > { %v527_v25 = vadd.f32 %v526_v22, %v496_v21  ;;  %v459_v26 = vadd.f32 %v458_v19, %v360_v45 }
 0x116   : > { %v528_v30 = vadd.f32 %v527_v25, %v497_v29  ;;  %v460_v37 = vadd.f32 %v459_v26, %v363_v60 }
 0x118   : > { %v461_v40 = vadd.f32 %v460_v37, %v1189_v20  ;;  %v529_v34 = vadd.f32 %v528_v30, %v498_v33 }
 0x119   : > { %928 = shalt.err (!%p925_p10)
}
 0x11a   : > { %s1008_s20 = smov 128   ;;  %s1009_s25 = smov 8   ;;  %v500_v20 = vmul.f32 %v1198_v23, %v1198_v23  ;;  %v462_v41 = vadd.f32 %v461_v40, %v1198_v23  ;;  %v530_v42 = vadd.f32 %v529_v34, %v499_v39  ;;  %v501_v43 = vmul.f32 %v1211_v27, %v1211_v27 }
 0x11b   : > { %781 = dma.vmem_to_hbm [thread:$0]  (%p1099_p3), %s574_s21, 4096, %s576_s22, %s556_s24, %s1008_s20, %s1008_s20, %s1009_s25   ;;  %v502_v46 = vmul.f32 %v1224_v31, %v1224_v31  ;;  %v503_v51 = vmul.f32 %v1237_v35, %v1237_v35  ;;  %v504_v54 = vmul.f32 %v1248_v49, %v1248_v49  ;;  %v505_v57 = vmul.f32 %v1258_v0, %v1258_v0 }
 0x11c   : > { %v463_v44 = vadd.f32 %v462_v41, %v1211_v27  ;;  %v531_v45 = vadd.f32 %v530_v42, %v500_v20  ;;  %v506_v58 = vmul.f32 %v387_v14, %v387_v14  ;;  %v507_v60 = vmul.f32 %v1200_v24, %v1200_v24  ;;  %s717_s18 = sshll.u32 %s1129_s6, 1  ;;  %s722_s23 = sshll.u32 %s1051_s16, 1 }
 0x11d   : > { %v508_v62 = vmul.f32 %v1213_v28, %v1213_v28  ;;  %v509_v2 = vmul.f32 %v1226_v32, %v1226_v32  ;;  %v510_v4 = vmul.f32 %v1239_v36, %v1239_v36  ;;  %v514_v12 = vmul.f32 %v1295_v38, %v1295_v38  ;;  %s588_s17 = scalar_lea.hbm %s1392_s3, %s722_s23  ;;  %s218_s21 = scalar_lea.vmem [#allocation8], %s717_s18 }
 0x11e   : > { %v532_v47 = vadd.f32 %v531_v45, %v501_v43  ;;  %v464_v48 = vadd.f32 %v463_v44, %v1224_v31  ;;  %s590_s22 = sshll.u32 %s218_s21, 4  ;;  %s592_s24 = sshll.u32 %s588_s17, 4  ;;  %vm552_vm0 = vcmask 1040384   ;;  %s591_s22 = int_to_ptr.vmem [resolvable:$true] %s590_s22  ;;  %s593_s24 = int_to_ptr.hbm [resolvable:$true] %s592_s24 }
 0x11f   : > { %s561_s16 = scalar_lea.sflag [#allocation9], %s1129_s6  ;;  %s943_s29 = sshra.s32 %s593_s24, 4  ;;  %s944_s29 = int_to_ptr.hbm [resolvable:$true] %s943_s29 }
 0x120   : > { %v465_v52 = vadd.f32 %v464_v48, %v1237_v35  ;;  %v533_v53 = vadd.f32 %v532_v47, %v502_v46  ;;  %s945_s30 = scalar_lea.hbm %s944_s29, 2  ;;  %s949_s9 = scalar_lea.hbm %s1392_s3, 4 }
 0x121   : > { %p946_p12 = scmp.ne.s32.totalorder %s944_s29, %s945_s30  ;;  %p950_p5 = scmp.lt.s32.totalorder %s944_s29, %s1392_s3 }
 0x122   : > { %v466_v23 = vadd.f32 %v465_v52, %v1248_v49  ;;  %v534_v55 = vadd.f32 %v533_v53, %v503_v51  ;;  %p951_p7 = scmp.lt.s32.totalorder %s949_s9, %s945_s30 }
 0x123   : > { %p947_p13 = pnand %p946_p12, %p1099_p3 }
 0x124   : > { %v535_v27 = vadd.f32 %v534_v55, %v504_v54  ;;  %v467_v56 = vadd.f32 %v466_v23, %v1258_v0  ;;  %p952_p1 = por %p951_p7, %p950_p5 }
 0x125   : > { %p948_p0 = pneg %p947_p13 }
 0x126   : > { %v536_v31 = vadd.f32 %v535_v27, %v505_v57  ;;  %v468_v59 = vadd.f32 %v467_v56, %v387_v14 }
 0x127   : > { %p953_p4 = pnand %p952_p1, %p948_p0 }
 0x128   : > { %v469_v35 = vadd.f32 %v468_v59, %v1200_v24  ;;  %v537_v61 = vadd.f32 %v536_v31, %v506_v58  ;;  %v511_v24 = vmul.f32 %v1250_v50, %v1250_v50 }
 0x12a   : > { %v470_v49 = vadd.f32 %v469_v35, %v1213_v28  ;;  %v538_v63 = vadd.f32 %v537_v61, %v507_v60 }
 0x12c   : > { %v471_v0 = vadd.f32 %v470_v49, %v1226_v32  ;;  %v539_v3 = vadd.f32 %v538_v63, %v508_v62  ;;  %v512_v32 = vmul.f32 %v1260_v1, %v1260_v1 }
 0x12e   : > { %v540_v5 = vadd.f32 %v539_v3, %v509_v2  ;;  %v472_v6 = vadd.f32 %v471_v0, %v1239_v36  ;;  %v513_v36 = vmul.f32 %v1280_v15, %v1280_v15 }
 0x130   : > { %v473_v7 = vadd.f32 %v472_v6, %v1250_v50  ;;  %v541_v8 = vadd.f32 %v540_v5, %v510_v4 }
 0x132   : > { %v474_v28 = vadd.f32 %v473_v7, %v1260_v1  ;;  %v542_v9 = vadd.f32 %v541_v8, %v511_v24 }
 0x134   : > { %v543_v10 = vadd.f32 %v542_v9, %v512_v32  ;;  %v475_v11 = vadd.f32 %v474_v28, %v1280_v15 }
 0x136   : > { %v544_v13 = vadd.f32 %v543_v10, %v513_v36  ;;  %v476_v50 = vadd.f32 %v475_v11, %v1295_v38 }
 0x138   : > { %v477_v14 = vrot.slane %v476_v50, 4  ;;  %v545_v16 = vadd.f32 %v544_v13, %v514_v12 }
 0x13a   : > { %v478_v17 = vadd.f32 %v477_v14, %v476_v50  ;;  %v546_v18 = vrot.slane %v545_v16, 4 }
 0x13c   : > { %v479_v19 = vrot.slane %v478_v17, 2  ;;  %v547_v21 = vadd.f32 %v546_v18, %v545_v16 }
 0x13e   : > { %v480_v1 = vadd.f32 %v479_v19, %v478_v17  ;;  %v548_v22 = vrot.slane %v547_v21, 2 }
 0x140   : > { %v481_v15 = vrot.slane %v480_v1, 1  ;;  %v549_v25 = vadd.f32 %v548_v22, %v547_v21 }
 0x142   : > { %v550_v26 = vrot.slane %v549_v25, 1  ;;  %v482_v29 = vadd.f32 %v481_v15, %v480_v1 }
 0x144   : > { %v551_v33 = vadd.f32 %v550_v26, %v549_v25 }
 0x146   : > { %v553_v30 = vsel %vm552_vm0, %v482_v29, %v551_v33 }
 0x147   : > { %554 = vst [vmem:[%s218_s21] sm:$0x3] %v553_v30 }
 0x148   : > { %956 = shalt.err (!%p953_p4)
}
 0x149   : > { %782 = dma.vmem_to_hbm [thread:$0]  (%p1099_p3), %s591_s22, 32, %s593_s24, %s561_s16  }
 0x14a PF: > { %s604_s6 = sand.u32 1, %s991_s12   ;;  %p1398_p8 = scmp.ge.s32.totalorder %s1003_s15, 2 }
 0x14b   : > { %s605_s20 = scalar_lea.sflag [#allocation4], %s604_s6 }
 0x14c   : > { %p794_p11 = pnand %p1398_p8, %p1065_p6 }
 0x14e   : > { %p795_p9 = pneg %p794_p11 }
 0x150   : > { %982 = dma.done.wait (%p795_p9), %s605_s20, 4096  }
 0x151   : > { %984 = vsyncadd (%p795_p9), %s605_s20, 4294963200  ;;  %s615_s25 = scalar_lea.sflag [#allocation9], %s604_s6 }
 0x152   : > { %986 = dma.done.wait (%p795_p9), %s615_s25, 32  }
 0x153   : > { %988 = vsyncadd (%p795_p9), %s615_s25, 4294967264  ;;  %p21_p3 = scmp.ge.s32.totalorder %s1083_s26, 4   ;;  %s1399_s12 = smov %s995_s13 }
 0x154   : > { %s1400_s13 = smov %s999_s14  ;;  %s1401_s14 = smov %s1095_s4 }
 0x155   : > { %s1402_s15 = smov %s1083_s26  ;;  %23 = sbr.rel (!%p21_p3) target bundleno = 8 (0x8), region = 94 }
 0x15a   :  { %621 = vsyncpa [#allocation3], 1 }
 0x15b   :  { %623 = vsyncpa [#allocation3 + $0x1], 1 }
 0x15c   :  { %624 = vsyncpa [#allocation6], 1 }
 0x15d   :  { %625 = vsyncpa [#allocation4], 1 }
 0x15e   :  { %627 = vsyncpa [#allocation4 + $0x1], 1 }
 0x15f   :  { %628 = vsyncpa [#allocation9], 1 }
 0x160   :  { %630 = vsyncpa [#allocation9 + $0x1], 1 }

</bundles_post_ra>
